<compile_context>
chip_gen: v5e
topology: v5e:2x2
jax: 0.10.0
libtpu: 0.0.40
codegen_flags: <defaults>
</compile_context>

<pallas_src>
import functools

import jax
import jax.numpy as jnp
from jax import lax
from jax.experimental import pallas as pl
from jax.experimental.pallas import tpu as pltpu

EPSILON = float(jnp.finfo(jnp.float32).eps)  # == torch.finfo(torch.float32).eps


def _round_up(v, m):
    return (v + m - 1) // m * m


def _shared_frnmf_kernel(h_ref, x_ref, w1t_ref, w2t_ref, o_ref, *, n_layers):
    h = h_ref[...]        # (TILE_N, comp_p)
    x = x_ref[...]        # (TILE_N, feat_p)
    w1t = w1t_ref[...]    # (comp_p, comp_p)   == fc1.weight.T (zero-padded)
    w2t = w2t_ref[...]    # (feat_p, comp_p)   == fc2.weight.T (zero-padded)

    # numerator = fc2(x): independent of h -> compute once, reuse every layer.
    num = jnp.dot(x, w2t, preferred_element_type=jnp.float32)

    def layer(_, h_cur):
        den = jnp.dot(h_cur, w1t, preferred_element_type=jnp.float32)
        # denominator[denominator == 0] = EPSILON
        den = jnp.where(den == 0.0, jnp.float32(EPSILON), den)
        # (num / den) * h, reassociated: two VPU muls + one EUP reciprocal.
        return (num * h_cur) * pl.reciprocal(den, approx=False)

    h = lax.fori_loop(0, n_layers, layer, h, unroll=True)
    o_ref[...] = h.astype(o_ref.dtype)


def shared_fr_dnmf_net(h, x, w1, w2, *, n_layers, tile_n_max=512):
    """Pallas SharedFrDNMFNet forward.

    h  : (N, comp)        float32  -- initial H
    x  : (N, features)    float32  -- data
    w1 : (comp, comp)     float32  -- fc1.weight (torch layout: out, in)
    w2 : (comp, features) float32  -- fc2.weight (torch layout: out, in)
    returns (N, comp) float32
    """
    n, comp = h.shape
    features = x.shape[1]
    assert w1.shape == (comp, comp)
    assert w2.shape == (comp, features)
    n_layers = int(n_layers)

    # Lane-dense padding: last dims up to multiples of 128, rows to TILE_N.
    comp_p = _round_up(comp, 128)
    feat_p = _round_up(features, 128)
    tile_n = min(int(tile_n_max), _round_up(n, 8))
    n_pad = _round_up(n, tile_n)

    f32 = jnp.float32
    # Pre-transpose + zero-pad weights once per call (hoist out of any outer
    # iterative loop when the same weights are reused across calls).
    w1t = jnp.zeros((comp_p, comp_p), f32).at[:comp, :comp].set(w1.T.astype(f32))
    w2t = jnp.zeros((feat_p, comp_p), f32).at[:features, :comp].set(w2.T.astype(f32))
    h_p = jnp.zeros((n_pad, comp_p), f32).at[:n, :comp].set(h.astype(f32))
    x_p = jnp.zeros((n_pad, feat_p), f32).at[:n, :features].set(x.astype(f32))
    # Padded rows/cols: num=0, den=0->eps, h=0  =>  stay exactly 0 every layer.

    kernel = functools.partial(_shared_frnmf_kernel, n_layers=n_layers)

    out = pl.pallas_call(
        kernel,
        out_shape=jax.ShapeDtypeStruct((n_pad, comp_p), f32),
        grid=(n_pad // tile_n,),
        in_specs=[
            pl.BlockSpec((tile_n, comp_p), lambda i: (i, 0)),   # h tile
            pl.BlockSpec((tile_n, feat_p), lambda i: (i, 0)),   # x tile
            pl.BlockSpec((comp_p, comp_p), lambda i: (0, 0)),   # W1^T resident
            pl.BlockSpec((feat_p, comp_p), lambda i: (0, 0)),   # W2^T resident
        ],
        out_specs=pl.BlockSpec((tile_n, comp_p), lambda i: (i, 0)),
        compiler_params=pltpu.CompilerParams(
            dimension_semantics=("parallel",),
        ),
    )(h_p, x_p, w1t, w2t)

    return out[:n, :comp]


def shared_fr_dnmf_net_ref(h, x, w1, w2, *, n_layers):
    """Pure-JAX reference mirroring the PyTorch module."""
    num = x @ w2.T
    for _ in range(n_layers):
        den = h @ w1.T
        den = jnp.where(den == 0.0, jnp.float32(EPSILON), den)
        h = (num / den) * h
    return h


if __name__ == "__main__":
    # Small shapes consistent with the module: N samples, comp components,
    # `features` feature length, a few shared-weight layers.
    N, COMP, FEATURES, N_LAYERS = 8, 32, 64, 4

    key = jax.random.PRNGKey(0)
    k_h, k_x, k_w1, k_w2 = jax.random.split(key, 4)

    # NMF factors / data are non-negative; keep everything positive so the
    # multiplicative updates stay well-conditioned.
    h0 = jax.random.uniform(k_h, (N, COMP), jnp.float32, minval=0.1, maxval=1.0)
    x = jax.random.uniform(k_x, (N, FEATURES), jnp.float32, minval=0.1, maxval=1.0)
    w1 = jax.random.uniform(k_w1, (COMP, COMP), jnp.float32, minval=0.01, maxval=1.0)
    w2 = jax.random.uniform(k_w2, (COMP, FEATURES), jnp.float32, minval=0.01, maxval=1.0)

    out = shared_fr_dnmf_net(h0, x, w1, w2, n_layers=N_LAYERS)
    out = jax.block_until_ready(out)

    ref = shared_fr_dnmf_net_ref(h0, x, w1, w2, n_layers=N_LAYERS)
    assert out.shape == (N, COMP)
    assert jnp.allclose(out, ref, rtol=1e-5, atol=1e-5), "mismatch vs reference"

    print("KERNEL_OK")
</pallas_src>

<mosaic_0001>
module attributes {stable_mosaic.version = 11 : i64} {
  func.func @_shared_frnmf_kernel(%arg0: i32, %arg1: memref<8x128xf32, #tpu.memory_space<vmem>>, %arg2: memref<8x128xf32, #tpu.memory_space<vmem>>, %arg3: memref<128x128xf32, #tpu.memory_space<vmem>>, %arg4: memref<128x128xf32, #tpu.memory_space<vmem>>, %arg5: memref<8x128xf32, #tpu.memory_space<vmem>>) attributes {dimension_semantics = [#tpu.dimension_semantics<parallel>], iteration_bounds = array<i64: 1>, scalar_prefetch = 0 : i64, scratch_operands = 0 : i64, tpu.core_type = #tpu.core_type<tc>, window_params = [{transform_indices = @transform_0, window_bounds = array<i64: 8, 128>}, {transform_indices = @transform_1, window_bounds = array<i64: 8, 128>}, {pipeline_mode = #tpu.pipeline_mode<synchronous>, transform_indices = @transform_2, window_bounds = array<i64: 128, 128>}, {pipeline_mode = #tpu.pipeline_mode<synchronous>, transform_indices = @transform_3, window_bounds = array<i64: 128, 128>}, {transform_indices = @transform_4, window_bounds = array<i64: 8, 128>}]} {
    %c0 = arith.constant 0 : index
    %c0_0 = arith.constant 0 : index
    %0 = vector.load %arg1[%c0, %c0_0] : memref<8x128xf32, #tpu.memory_space<vmem>>, vector<8x128xf32>
    %c0_1 = arith.constant 0 : index
    %c0_2 = arith.constant 0 : index
    %1 = vector.load %arg2[%c0_1, %c0_2] : memref<8x128xf32, #tpu.memory_space<vmem>>, vector<8x128xf32>
    %c0_3 = arith.constant 0 : index
    %c0_4 = arith.constant 0 : index
    %2 = vector.load %arg3[%c0_3, %c0_4] : memref<128x128xf32, #tpu.memory_space<vmem>>, vector<128x128xf32>
    %c0_5 = arith.constant 0 : index
    %c0_6 = arith.constant 0 : index
    %3 = vector.load %arg4[%c0_5, %c0_6] : memref<128x128xf32, #tpu.memory_space<vmem>>, vector<128x128xf32>
    %cst = arith.constant dense<0.000000e+00> : vector<8x128xf32>
    %4 = tpu.matmul %1, %3, %cst {dimension_numbers = #tpu.dot_dimension_numbers<[1], [0], [0], [1], [0, 0, 1, 1], [], []>} : vector<8x128xf32>, vector<128x128xf32>, vector<8x128xf32> -> vector<8x128xf32>
    %c0_i32 = arith.constant 0 : i32
    %cst_7 = arith.constant dense<0.000000e+00> : vector<8x128xf32>
    %5 = tpu.matmul %0, %2, %cst_7 {dimension_numbers = #tpu.dot_dimension_numbers<[1], [0], [0], [1], [0, 0, 1, 1], [], []>} : vector<8x128xf32>, vector<128x128xf32>, vector<8x128xf32> -> vector<8x128xf32>
    %cst_8 = arith.constant 0.000000e+00 : f32
    %6 = vector.broadcast %cst_8 : f32 to vector<8x128xf32>
    %7 = arith.cmpf oeq, %5, %6 : vector<8x128xf32>
    %cst_9 = arith.constant 1.1920929E-7 : f32
    %8 = vector.broadcast %cst_9 : f32 to vector<8x128xf32>
    %9 = arith.select %7, %8, %5 : vector<8x128xi1>, vector<8x128xf32>
    %10 = arith.mulf %4, %0 : vector<8x128xf32>
    %11 = tpu.reciprocal %9 : vector<8x128xf32> -> vector<8x128xf32>
    %12 = arith.mulf %10, %11 : vector<8x128xf32>
    %c1_i32 = arith.constant 1 : i32
    %cst_10 = arith.constant dense<0.000000e+00> : vector<8x128xf32>
    %13 = tpu.matmul %12, %2, %cst_10 {dimension_numbers = #tpu.dot_dimension_numbers<[1], [0], [0], [1], [0, 0, 1, 1], [], []>} : vector<8x128xf32>, vector<128x128xf32>, vector<8x128xf32> -> vector<8x128xf32>
    %cst_11 = arith.constant 0.000000e+00 : f32
    %14 = vector.broadcast %cst_11 : f32 to vector<8x128xf32>
    %15 = arith.cmpf oeq, %13, %14 : vector<8x128xf32>
    %cst_12 = arith.constant 1.1920929E-7 : f32
    %16 = vector.broadcast %cst_12 : f32 to vector<8x128xf32>
    %17 = arith.select %15, %16, %13 : vector<8x128xi1>, vector<8x128xf32>
    %18 = arith.mulf %4, %12 : vector<8x128xf32>
    %19 = tpu.reciprocal %17 : vector<8x128xf32> -> vector<8x128xf32>
    %20 = arith.mulf %18, %19 : vector<8x128xf32>
    %c2_i32 = arith.constant 2 : i32
    %cst_13 = arith.constant dense<0.000000e+00> : vector<8x128xf32>
    %21 = tpu.matmul %20, %2, %cst_13 {dimension_numbers = #tpu.dot_dimension_numbers<[1], [0], [0], [1], [0, 0, 1, 1], [], []>} : vector<8x128xf32>, vector<128x128xf32>, vector<8x128xf32> -> vector<8x128xf32>
    %cst_14 = arith.constant 0.000000e+00 : f32
    %22 = vector.broadcast %cst_14 : f32 to vector<8x128xf32>
    %23 = arith.cmpf oeq, %21, %22 : vector<8x128xf32>
    %cst_15 = arith.constant 1.1920929E-7 : f32
    %24 = vector.broadcast %cst_15 : f32 to vector<8x128xf32>
    %25 = arith.select %23, %24, %21 : vector<8x128xi1>, vector<8x128xf32>
    %26 = arith.mulf %4, %20 : vector<8x128xf32>
    %27 = tpu.reciprocal %25 : vector<8x128xf32> -> vector<8x128xf32>
    %28 = arith.mulf %26, %27 : vector<8x128xf32>
    %c3_i32 = arith.constant 3 : i32
    %cst_16 = arith.constant dense<0.000000e+00> : vector<8x128xf32>
    %29 = tpu.matmul %28, %2, %cst_16 {dimension_numbers = #tpu.dot_dimension_numbers<[1], [0], [0], [1], [0, 0, 1, 1], [], []>} : vector<8x128xf32>, vector<128x128xf32>, vector<8x128xf32> -> vector<8x128xf32>
    %cst_17 = arith.constant 0.000000e+00 : f32
    %30 = vector.broadcast %cst_17 : f32 to vector<8x128xf32>
    %31 = arith.cmpf oeq, %29, %30 : vector<8x128xf32>
    %cst_18 = arith.constant 1.1920929E-7 : f32
    %32 = vector.broadcast %cst_18 : f32 to vector<8x128xf32>
    %33 = arith.select %31, %32, %29 : vector<8x128xi1>, vector<8x128xf32>
    %34 = arith.mulf %4, %28 : vector<8x128xf32>
    %35 = tpu.reciprocal %33 : vector<8x128xf32> -> vector<8x128xf32>
    %36 = arith.mulf %34, %35 : vector<8x128xf32>
    %c0_19 = arith.constant 0 : index
    %c0_20 = arith.constant 0 : index
    %37 = vector.load %arg5[%c0_19, %c0_20] : memref<8x128xf32, #tpu.memory_space<vmem>>, vector<8x128xf32>
    tpu.vector_store %arg5[%c0_19, %c0_20], %36 {strides = array<i32>} : memref<8x128xf32, #tpu.memory_space<vmem>>, vector<8x128xf32>,
    return
  }
  func.func @transform_0(%arg0: i32) -> (i32, i32) {
    %c0_i32 = arith.constant 0 : i32
    %c0_i32_0 = arith.constant 0 : i32
    return %arg0, %c0_i32 : i32, i32
  }
  func.func @transform_1(%arg0: i32) -> (i32, i32) {
    %c0_i32 = arith.constant 0 : i32
    %c0_i32_0 = arith.constant 0 : i32
    return %arg0, %c0_i32 : i32, i32
  }
  func.func @transform_2(%arg0: i32) -> (i32, i32) {
    %c0_i32 = arith.constant 0 : i32
    %c0_i32_0 = arith.constant 0 : i32
    %c0_i32_1 = arith.constant 0 : i32
    return %c0_i32, %c0_i32_0 : i32, i32
  }
  func.func @transform_3(%arg0: i32) -> (i32, i32) {
    %c0_i32 = arith.constant 0 : i32
    %c0_i32_0 = arith.constant 0 : i32
    %c0_i32_1 = arith.constant 0 : i32
    return %c0_i32, %c0_i32_0 : i32, i32
  }
  func.func @transform_4(%arg0: i32) -> (i32, i32) {
    %c0_i32 = arith.constant 0 : i32
    %c0_i32_0 = arith.constant 0 : i32
    return %arg0, %c0_i32 : i32, i32
  }
}

</mosaic_0001>

<bundles_post_ra>
// kernel: tpu_custom_call.1
= control target key start
LH: loop header
LB: loop body
LE: loop exit
PB: predicated region body
PF: predicated region fallthrough
CT: control target
= control target key end

     0   :  { %9 = vsyncpa [#allocation3], 0  ;;  %s553_s0 = inlined_call_operand.hbm [shape: f32[8,128], index: 0, kind: input, shape index: {}]   ;;  %s554_s1 = inlined_call_operand.hbm [shape: f32[8,128], index: 1, kind: input, shape index: {}]   ;;  %s555_s2 = inlined_call_operand.hbm [shape: f32[128,128], index: 2, kind: input, shape index: {}]   ;;  %s556_s3 = inlined_call_operand.hbm [shape: f32[128,128], index: 3, kind: input, shape index: {}]   ;;  %s557_s4 = inlined_call_operand.hbm [shape: f32[8,128], index: 4, kind: output, shape index: {}]  }
   0x1   :  { %10 = vsyncpa [#allocation6], 0 }
   0x2   :  { %11 = vsyncpa [#allocation9], 0  ;;  %s29_s17 = sshll.u32 %s554_s1, 4  ;;  %s30_s17 = int_to_ptr.hbm [resolvable:$true] %s29_s17 }
   0x3   :  { %12 = vsyncpa [#allocation4], 0  ;;  %s446_s18 = smov [#allocation5]   ;;  %s18_s22 = sshll.u32 %s553_s0, 4  ;;  %s19_s22 = int_to_ptr.hbm [resolvable:$true] %s18_s22 }
   0x4   :  { %s31_s19 = sshll.u32 %s446_s18, 4  ;;  %s447_s23 = smov [#allocation2]   ;;  %s32_s19 = int_to_ptr.vmem [resolvable:$true] %s31_s19 }
   0x5   :  { %34 = dma.hbm_to_vmem [thread:$0]  %s30_s17, 128, %s32_s19, [#allocation6]  }
   0x6   :  { %s20_s24 = sshll.u32 %s447_s23, 4  ;;  %s39_s27 = sshll.u32 %s555_s2, 4  ;;  %s21_s24 = int_to_ptr.vmem [resolvable:$true] %s20_s24  ;;  %s40_s27 = int_to_ptr.hbm [resolvable:$true] %s39_s27 }
   0x7   :  { %23 = dma.hbm_to_vmem [thread:$0]  %s19_s22, 128, %s21_s24, [#allocation3]  }
   0x8   :  { %s448_s1 = smov [#allocation7]   ;;  %s52_s5 = sshll.u32 %s556_s3, 4  ;;  %s53_s5 = int_to_ptr.hbm [resolvable:$true] %s52_s5 }
   0x9   :  { %s41_s28 = sshll.u32 %s448_s1, 4  ;;  %s449_s6 = smov 128   ;;  %s42_s28 = int_to_ptr.vmem [resolvable:$true] %s41_s28 }
   0xa   :  { %s450_s0 = smov 8   ;;  %s451_s7 = smov [#allocation8]  }
   0xb   :  { %47 = dma.hbm_to_vmem [thread:$0]  %s40_s27, 2048, %s42_s28, [#allocation6], %s449_s6, %s449_s6, %s450_s0  }
   0xc   :  { %s54_s8 = sshll.u32 %s451_s7, 4  ;;  %s55_s8 = int_to_ptr.vmem [resolvable:$true] %s54_s8 }
   0xd   :  { %60 = dma.hbm_to_vmem [thread:$0]  %s53_s5, 2048, %s55_s8, [#allocation9], %s449_s6, %s449_s6, %s450_s0  }
   0xe   :  { %438 = dma.done.wait [#allocation3], 128  }
   0xf   :  { %439 = vsyncadd [#allocation3], 4294967168 }
  0x10   :  { %440 = dma.done.wait [#allocation6], 2176  }
  0x11   :  { %441 = vsyncadd [#allocation6], 4294965120 }
  0x12   :  { %442 = dma.done.wait [#allocation9], 2048  }
  0x13   :  { %443 = vsyncadd [#allocation9], 4294965248  ;;  %v490_v0 = vld [vmem:[#allocation7 + $0x78] sm:$0xff]  ;;  %v492_v1 = vld [vmem:[#allocation7 + $0x70] sm:$0xff]  ;;  %s452_s2 = smov [#allocation10]   ;;  %s291_s11 = sshll.u32 %s557_s4, 4  ;;  %s292_s11 = int_to_ptr.hbm [resolvable:$true] %s291_s11 }
  0x14   :  { %131 = vmatpush.msra.mxu1 %v490_v0  ;;  %169 = vmatpush.msra.mxu2 %v490_v0  ;;  %v496_v2 = vld [vmem:[#allocation7 + $0x68] sm:$0xff]  ;;  %v110_v3 = vld [vmem:[#allocation8 + $0x78] sm:$0xff]  ;;  %v109_v4 = vld [vmem:[#allocation8 + $0x70] sm:$0xff]  ;;  %s289_s3 = sshll.u32 %s452_s2, 4  ;;  %s290_s3 = int_to_ptr.vmem [resolvable:$true] %s289_s3 }
  0x15   :  { %207 = vmatpush.msra.mxu3 %v490_v0  ;;  %v501_v5 = vld [vmem:[#allocation7 + $0x60] sm:$0xff]  ;;  %111 = vmatpush.msra.mxu0 %v110_v3  ;;  %v108_v6 = vld [vmem:[#allocation8 + $0x68] sm:$0xff]  ;;  %v506_v7 = vld [vmem:[#allocation7 + $0x58] sm:$0xff] }
  0x16   :  { %132 = vmatpush.msra.mxu1 %v492_v1  ;;  %170 = vmatpush.msra.mxu2 %v492_v1  ;;  %v107_v8 = vld [vmem:[#allocation8 + $0x60] sm:$0xff]  ;;  %v511_v9 = vld [vmem:[#allocation7 + $0x50] sm:$0xff]  ;;  %v106_v10 = vld [vmem:[#allocation8 + $0x58] sm:$0xff] }
  0x17   :  { %208 = vmatpush.msra.mxu3 %v492_v1  ;;  %112 = vmatpush.msra.mxu0 %v109_v4  ;;  %v516_v11 = vld [vmem:[#allocation7 + $0x48] sm:$0xff]  ;;  %v105_v12 = vld [vmem:[#allocation8 + $0x50] sm:$0xff]  ;;  %v521_v13 = vld [vmem:[#allocation7 + $0x40] sm:$0xff] }
  0x18   :  { %133 = vmatpush.msra.mxu1 %v496_v2  ;;  %171 = vmatpush.msra.mxu2 %v496_v2  ;;  %v104_v14 = vld [vmem:[#allocation8 + $0x48] sm:$0xff]  ;;  %v526_v15 = vld [vmem:[#allocation7 + $0x38] sm:$0xff]  ;;  %v103_v16 = vld [vmem:[#allocation8 + $0x40] sm:$0xff] }
  0x19   :  { %209 = vmatpush.msra.mxu3 %v496_v2  ;;  %113 = vmatpush.msra.mxu0 %v108_v6  ;;  %v85_v17 = vld [vmem:[#allocation7 + $0x30] sm:$0xff]  ;;  %v102_v18 = vld [vmem:[#allocation8 + $0x38] sm:$0xff]  ;;  %v84_v19 = vld [vmem:[#allocation7 + $0x28] sm:$0xff] }
  0x1a   :  { %134 = vmatpush.msra.mxu1 %v501_v5  ;;  %172 = vmatpush.msra.mxu2 %v501_v5  ;;  %v101_v20 = vld [vmem:[#allocation8 + $0x30] sm:$0xff]  ;;  %v83_v21 = vld [vmem:[#allocation7 + $0x20] sm:$0xff]  ;;  %v100_v22 = vld [vmem:[#allocation8 + $0x28] sm:$0xff] }
  0x1b   :  { %210 = vmatpush.msra.mxu3 %v501_v5  ;;  %114 = vmatpush.msra.mxu0 %v107_v8  ;;  %v82_v23 = vld [vmem:[#allocation7 + $0x18] sm:$0xff]  ;;  %v99_v24 = vld [vmem:[#allocation8 + $0x20] sm:$0xff]  ;;  %v81_v25 = vld [vmem:[#allocation7 + $0x10] sm:$0xff] }
  0x1c   :  { %135 = vmatpush.msra.mxu1 %v506_v7  ;;  %173 = vmatpush.msra.mxu2 %v506_v7  ;;  %v98_v26 = vld [vmem:[#allocation8 + $0x18] sm:$0xff]  ;;  %v80_v27 = vld [vmem:[#allocation7 + $0x8] sm:$0xff]  ;;  %v97_v28 = vld [vmem:[#allocation8 + $0x10] sm:$0xff] }
  0x1d   :  { %211 = vmatpush.msra.mxu3 %v506_v7  ;;  %115 = vmatpush.msra.mxu0 %v106_v10  ;;  %v79_v29 = vld [vmem:[#allocation7] sm:$0xff]  ;;  %v77_v30 = vld [vmem:[#allocation2] sm:$0xff]  ;;  %v96_v31 = vld [vmem:[#allocation8 + $0x8] sm:$0xff] }
  0x1e   :  { %136 = vmatpush.msra.mxu1 %v511_v9  ;;  %174 = vmatpush.msra.mxu2 %v511_v9  ;;  %v95_v32 = vld [vmem:[#allocation8] sm:$0xff]  ;;  %v78_v33 = vld [vmem:[#allocation5] sm:$0xff] }
  0x1f   :  { %212 = vmatpush.msra.mxu3 %v511_v9  ;;  %116 = vmatpush.msra.mxu0 %v105_v12 }
  0x20   :  { %137 = vmatpush.msra.mxu1 %v516_v11  ;;  %175 = vmatpush.msra.mxu2 %v516_v11 }
  0x21   :  { %213 = vmatpush.msra.mxu3 %v516_v11  ;;  %117 = vmatpush.msra.mxu0 %v104_v14 }
  0x22   :  { %138 = vmatpush.msra.mxu1 %v521_v13  ;;  %176 = vmatpush.msra.mxu2 %v521_v13 }
  0x23   :  { %214 = vmatpush.msra.mxu3 %v521_v13  ;;  %118 = vmatpush.msra.mxu0 %v103_v16 }
  0x24   :  { %139 = vmatpush.msra.mxu1 %v526_v15  ;;  %177 = vmatpush.msra.mxu2 %v526_v15 }
  0x25   :  { %215 = vmatpush.msra.mxu3 %v526_v15  ;;  %119 = vmatpush.msra.mxu0 %v102_v18 }
  0x26   :  { %140 = vmatpush.msra.mxu1 %v85_v17  ;;  %178 = vmatpush.msra.mxu2 %v85_v17 }
  0x27   :  { %216 = vmatpush.msra.mxu3 %v85_v17  ;;  %120 = vmatpush.msra.mxu0 %v101_v20 }
  0x28   :  { %141 = vmatpush.msra.mxu1 %v84_v19  ;;  %179 = vmatpush.msra.mxu2 %v84_v19 }
  0x29   :  { %217 = vmatpush.msra.mxu3 %v84_v19  ;;  %121 = vmatpush.msra.mxu0 %v100_v22 }
  0x2a   :  { %142 = vmatpush.msra.mxu1 %v83_v21  ;;  %180 = vmatpush.msra.mxu2 %v83_v21 }
  0x2b   :  { %218 = vmatpush.msra.mxu3 %v83_v21  ;;  %122 = vmatpush.msra.mxu0 %v99_v24 }
  0x2c   :  { %143 = vmatpush.msra.mxu1 %v82_v23  ;;  %181 = vmatpush.msra.mxu2 %v82_v23 }
  0x2d   :  { %219 = vmatpush.msra.mxu3 %v82_v23  ;;  %123 = vmatpush.msra.mxu0 %v98_v26 }
  0x2e   :  { %144 = vmatpush.msra.mxu1 %v81_v25  ;;  %182 = vmatpush.msra.mxu2 %v81_v25 }
  0x2f   :  { %220 = vmatpush.msra.mxu3 %v81_v25  ;;  %124 = vmatpush.msra.mxu0 %v97_v28 }
  0x30   :  { %145 = vmatpush.msra.mxu1 %v80_v27  ;;  %183 = vmatpush.msra.mxu2 %v80_v27 }
  0x31   :  { %221 = vmatpush.msra.mxu3 %v80_v27  ;;  %125 = vmatpush.msra.mxu0 %v96_v31 }
  0x32   :  { %146 = vmatpush.msra.mxu1 %v79_v29  ;;  %184 = vmatpush.msra.mxu2 %v79_v29 }
  0x33   :  { %147 = vmatmul.f32.vlgmr.msra.gmra.mxu1 %v77_v30  ;;  %222 = vmatpush.msra.mxu3 %v79_v29 }
  0x34   :  { %126 = vmatpush.msra.mxu0 %v95_v32 }
  0x35   :  { %127 = vmatmul.f32.vlgmr.msra.gmra.mxu0 %v78_v33 }
  0x36   :  { %245 = vmatpush.msrb.mxu0 %v490_v0 }
  0x38   :  { %246 = vmatpush.msrb.mxu0 %v492_v1 }
  0x3a   :  { %247 = vmatpush.msrb.mxu0 %v496_v2 }
  0x3c   :  { %248 = vmatpush.msrb.mxu0 %v501_v5 }
  0x3e   :  { %249 = vmatpush.msrb.mxu0 %v506_v7 }
  0x40   :  { %250 = vmatpush.msrb.mxu0 %v511_v9 }
  0x42   :  { %251 = vmatpush.msrb.mxu0 %v516_v11 }
  0x44   :  { %252 = vmatpush.msrb.mxu0 %v521_v13 }
  0x46   :  { %253 = vmatpush.msrb.mxu0 %v526_v15 }
  0x48   :  { %254 = vmatpush.msrb.mxu0 %v85_v17 }
  0x4a   :  { %255 = vmatpush.msrb.mxu0 %v84_v19 }
  0x4c   :  { %256 = vmatpush.msrb.mxu0 %v83_v21 }
  0x4e   :  { %257 = vmatpush.msrb.mxu0 %v82_v23 }
  0x50   :  { %258 = vmatpush.msrb.mxu0 %v81_v25 }
  0x52   :  { %259 = vmatpush.msrb.mxu0 %v80_v27 }
  0x54   :  { %260 = vmatpush.msrb.mxu0 %v79_v29 }
  0xb0   :  { %v148_v34 = vpop.f32.mrf.mxu1 }
  0xb1   :  { %vm151_vm0 = vcmp.eq.f32.partialorder %v148_v34, 0.0 }
  0xb2   :  { %v152_v35 = vsel %vm151_vm0, 1.1920929e-07, %v148_v34  ;;  %v544_v40 = vpop.f32.mrf.mxu0 }
  0xb3   :  { %310 = vrcp.f32 %v152_v35  ;;  %v165_v39 = vand.u32 2147483648, %v152_v35  ;;  %v163_v42 = vand.u32 2147483647, %v152_v35  ;;  %vm159_vm2 = vweird.f32 %v152_v35 }
  0xb4   :  { %v153_v43 = vmul.f32 %v544_v40, %v77_v30 }
  0xb5   :  { %v166_v45 = vor.u32 1.1754944e-38, %v165_v39  ;;  %vm164_vm4 = vcmp.eq.f32.partialorder %v163_v42, 8.507059e+37 }
  0xb9   :  { %v311_v36 = vpop.eup %310 }
  0xba   :  { %v155_v37 = vmul.f32 %v311_v36, %v152_v35  ;;  %vm160_vm1 = vweird.f32 %v311_v36 }
  0xbb   :  { %vm161_vm3 = vmor %vm159_vm2, %vm160_vm1 }
  0xbc   :  { %v156_v38 = vsub.f32 1.0, %v155_v37 }
  0xbe   :  { %v157_v41 = vmul.f32 %v311_v36, %v156_v38 }
  0xc0   :  { %v158_v44 = vadd.f32 %v311_v36, %v157_v41 }
  0xc2   :  { %v162_v46 = vsel %vm161_vm3, %v311_v36, %v158_v44 }
  0xc3   :  { %v167_v47 = vsel %vm164_vm4, %v166_v45, %v162_v46 }
  0xc4   :  { %v168_v48 = vmul.f32 %v167_v47, %v153_v43 }
  0xc6   :  { %185 = vmatmul.f32.vlgmr.msra.gmra.mxu2 %v168_v48  ;;  %v191_v59 = vmul.f32 %v168_v48, %v544_v40 }
 0x149   :  { %v186_v49 = vpop.f32.mrf.mxu2 }
 0x14a   :  { %vm189_vm5 = vcmp.eq.f32.partialorder %v186_v49, 0.0 }
 0x14b   :  { %v190_v50 = vsel %vm189_vm5, 1.1920929e-07, %v186_v49 }
 0x14c   :  { %312 = vrcp.f32 %v190_v50  ;;  %v203_v54 = vand.u32 2147483648, %v190_v50  ;;  %v201_v56 = vand.u32 2147483647, %v190_v50  ;;  %vm197_vm7 = vweird.f32 %v190_v50 }
 0x14e   :  { %v204_v58 = vor.u32 1.1754944e-38, %v203_v54  ;;  %vm202_vm9 = vcmp.eq.f32.partialorder %v201_v56, 8.507059e+37 }
 0x152   :  { %v313_v51 = vpop.eup %312 }
 0x153   :  { %v193_v52 = vmul.f32 %v313_v51, %v190_v50  ;;  %vm198_vm6 = vweird.f32 %v313_v51 }
 0x154   :  { %vm199_vm8 = vmor %vm197_vm7, %vm198_vm6 }
 0x155   :  { %v194_v53 = vsub.f32 1.0, %v193_v52 }
 0x157   :  { %v195_v55 = vmul.f32 %v313_v51, %v194_v53 }
 0x159   :  { %v196_v57 = vadd.f32 %v313_v51, %v195_v55 }
 0x15b   :  { %v200_v60 = vsel %vm199_vm8, %v313_v51, %v196_v57 }
 0x15c   :  { %v205_v61 = vsel %vm202_vm9, %v204_v58, %v200_v60 }
 0x15d   :  { %v206_v62 = vmul.f32 %v205_v61, %v191_v59 }
 0x15f   :  { %223 = vmatmul.f32.vlgmr.msra.gmra.mxu3 %v206_v62  ;;  %v229_v9 = vmul.f32 %v206_v62, %v544_v40 }
 0x1e2   :  { %v224_v63 = vpop.f32.mrf.mxu3 }
 0x1e3   :  { %vm227_vm10 = vcmp.eq.f32.partialorder %v224_v63, 0.0 }
 0x1e4   :  { %v228_v0 = vsel %vm227_vm10, 1.1920929e-07, %v224_v63 }
 0x1e5   :  { %314 = vrcp.f32 %v228_v0  ;;  %v241_v4 = vand.u32 2147483648, %v228_v0  ;;  %v239_v6 = vand.u32 2147483647, %v228_v0  ;;  %vm235_vm12 = vweird.f32 %v228_v0 }
 0x1e7   :  { %v242_v8 = vor.u32 1.1754944e-38, %v241_v4  ;;  %vm240_vm14 = vcmp.eq.f32.partialorder %v239_v6, 8.507059e+37 }
 0x1eb   :  { %v315_v1 = vpop.eup %314 }
 0x1ec   :  { %v231_v2 = vmul.f32 %v315_v1, %v228_v0  ;;  %vm236_vm11 = vweird.f32 %v315_v1 }
 0x1ed   :  { %vm237_vm13 = vmor %vm235_vm12, %vm236_vm11 }
 0x1ee   :  { %v232_v3 = vsub.f32 1.0, %v231_v2 }
 0x1f0   :  { %v233_v5 = vmul.f32 %v315_v1, %v232_v3 }
 0x1f2   :  { %v234_v7 = vadd.f32 %v315_v1, %v233_v5 }
 0x1f4   :  { %v238_v10 = vsel %vm237_vm13, %v315_v1, %v234_v7 }
 0x1f5   :  { %v243_v11 = vsel %vm240_vm14, %v242_v8, %v238_v10 }
 0x1f6   :  { %v244_v12 = vmul.f32 %v243_v11, %v229_v9 }
 0x1f8   :  { %261 = vmatmul.f32.vlgmr.msrb.gmra.mxu0 %v244_v12  ;;  %v267_v23 = vmul.f32 %v244_v12, %v544_v40 }
 0x275   :  { %v262_v13 = vpop.f32.mrf.mxu0 }
 0x276   :  { %vm265_vm15 = vcmp.eq.f32.partialorder %v262_v13, 0.0 }
 0x277   :  { %v266_v14 = vsel %vm265_vm15, 1.1920929e-07, %v262_v13 }
 0x278   :  { %316 = vrcp.f32 %v266_v14  ;;  %v279_v18 = vand.u32 2147483648, %v266_v14  ;;  %v277_v20 = vand.u32 2147483647, %v266_v14  ;;  %vm273_vm1 = vweird.f32 %v266_v14 }
 0x27a   :  { %v280_v22 = vor.u32 1.1754944e-38, %v279_v18  ;;  %vm278_vm3 = vcmp.eq.f32.partialorder %v277_v20, 8.507059e+37 }
 0x27e   :  { %v317_v15 = vpop.eup %316 }
 0x27f   :  { %v269_v16 = vmul.f32 %v317_v15, %v266_v14  ;;  %vm274_vm0 = vweird.f32 %v317_v15 }
 0x280   :  { %vm275_vm2 = vmor %vm273_vm1, %vm274_vm0 }
 0x281   :  { %v270_v17 = vsub.f32 1.0, %v269_v16 }
 0x283   :  { %v271_v19 = vmul.f32 %v317_v15, %v270_v17 }
 0x285   :  { %v272_v21 = vadd.f32 %v317_v15, %v271_v19 }
 0x287   :  { %v276_v24 = vsel %vm275_vm2, %v317_v15, %v272_v21 }
 0x288   :  { %v281_v25 = vsel %vm278_vm3, %v280_v22, %v276_v24 }
 0x289   :  { %v282_v26 = vmul.f32 %v281_v25, %v267_v23 }
 0x28b   :  { %283 = vst [vmem:[#allocation10] sm:$0xff] %v282_v26 }
 0x28c   :  { %294 = dma.vmem_to_hbm [thread:$0]  %s290_s3, 128, %s292_s11, [#allocation4]  }
 0x28d   :  { %444 = dma.done.wait [#allocation4], 128  }
 0x28e   :  { %445 = vsyncadd [#allocation4], 4294967168 }
 0x28f   :  { %299 = vsyncpa [#allocation3], 1 }
 0x290   :  { %300 = vsyncpa [#allocation6], 1 }
 0x291   :  { %301 = vsyncpa [#allocation9], 1 }
 0x292   :  { %302 = vsyncpa [#allocation4], 1 }

</bundles_post_ra>
